<compile_context>
chip_gen: v6e
topology: v6e:2x2x1
jax: 0.10.0
libtpu: 0.0.40
codegen_flags: <defaults>
</compile_context>

<pallas_src>
import functools
from math import sqrt

import jax
import jax.numpy as jnp
from jax.experimental import pallas as pl
from jax.experimental.pallas import tpu as pltpu

NEG_INF = -100000.0


# ----------------------------------------------------------------------------
# Pallas kernel: one (batch, m-tile) per grid step.
# ----------------------------------------------------------------------------
def _mha_kernel(q_ref, k_ref, v_ref,
                wq_ref, wk_ref, wv_ref, wo_ref,
                b_ref, mask_ref,
                out_ref,
                *, scale, causal, n_heads, head_dim):
    tm = q_ref.shape[1]
    n = k_ref.shape[1]

    def matT(x, w):
        # x @ w.T expressed as a trans_b contraction (no materialized transpose).
        return jax.lax.dot_general(
            x, w, dimension_numbers=(((1,), (1,)), ((), ())),
            preferred_element_type=jnp.float32)

    q_in = q_ref[0]                      # (tm, E)
    k_in = k_ref[0]                      # (n, E)
    v_in = v_ref[0]                      # (n, E)

    # Fused full-E projections (nn.Linear: x @ W.T + b), f32 accumulation.
    qh = matT(q_in, wq_ref[...]) + b_ref[0:1, :]       # (tm, E)
    kh = matT(k_in, wk_ref[...]) + b_ref[1:2, :]       # (n, E)
    vh = matT(v_in, wv_ref[...]) + b_ref[2:3, :]       # (n, E)

    # Masks: built once per (batch, m-tile), shared by every head.
    dead = mask_ref[0] > 0.5                            # (1, n) padding mask
    if causal:
        row = pl.program_id(1) * tm + jax.lax.broadcasted_iota(jnp.int32, (tm, n), 0)
        col = jax.lax.broadcasted_iota(jnp.int32, (tm, n), 1)
        dead = jnp.logical_or(dead, col > row)          # (tm, n)

    # Per-head attention (static unroll; lane slices of width head_dim).
    pooled_parts = []
    for h in range(n_heads):
        sl = slice(h * head_dim, (h + 1) * head_dim)
        s = matT(qh[:, sl], kh[:, sl]) * scale          # (tm, n)
        s = jnp.where(dead, NEG_INF, s)
        s_max = jnp.max(s, axis=-1, keepdims=True)
        e = jnp.exp(s - s_max)
        denom = jnp.sum(e, axis=-1, keepdims=True)
        inv = pl.reciprocal(denom, approx=True)
        inv = inv * (2.0 - denom * inv)                 # one Newton step for accuracy
        w = e * inv
        pooled_parts.append(jnp.dot(w, vh[:, sl],
                                    preferred_element_type=jnp.float32))  # (tm, d)

    pooled = jnp.concatenate(pooled_parts, axis=-1)     # (tm, E)

    # Single full-E output projection.
    out = matT(pooled, wo_ref[...]) + b_ref[3:4, :]     # (tm, E)
    out_ref[0] = out.astype(out_ref.dtype)


# ----------------------------------------------------------------------------
# Parameter construction (deterministic xavier_uniform like the PyTorch module)
# ----------------------------------------------------------------------------
def xavier_linear_params(key, input_dim, output_dim):
    # nn.Linear.weight has shape (out, in); xavier_uniform bound = sqrt(6/(in+out))
    bound = sqrt(6.0 / (input_dim + output_dim))
    w = jax.random.uniform(key, (output_dim, input_dim), jnp.float32, -bound, bound)
    b = jnp.zeros((output_dim,), jnp.float32)
    return w, b


def init_mha_params(key, embed_dim, n_heads):
    del n_heads  # projection sizes are all embed_dim here
    k1, k2, k3, k4 = jax.random.split(key, 4)
    return {
        "query": xavier_linear_params(k1, embed_dim, embed_dim),
        "key": xavier_linear_params(k2, embed_dim, embed_dim),
        "value": xavier_linear_params(k3, embed_dim, embed_dim),
        "output": xavier_linear_params(k4, embed_dim, embed_dim),
    }


# ----------------------------------------------------------------------------
# Wrapper
# ----------------------------------------------------------------------------
def multi_head_attention(queries, keys, values, params, n_heads,
                         in_mask=None, causal_masking=False):
    m, bsz, E = queries.shape
    n = keys.shape[0]
    if E % n_heads != 0:
        raise ValueError("embed_dim must be a multiple of n_heads")
    d = E // n_heads

    # (len, batch, E) -> (batch, len, E) so batch rides a grid axis cleanly.
    q_b = jnp.transpose(queries, (1, 0, 2))
    k_b = jnp.transpose(keys, (1, 0, 2))
    v_b = jnp.transpose(values, (1, 0, 2))

    wq, bq = params["query"]
    wk, bk = params["key"]
    wv, bv = params["value"]
    wo, bo = params["output"]
    biases = jnp.stack([bq, bk, bv, bo], axis=0)        # (4, E) packed biases

    if in_mask is None:
        mask_b = jnp.zeros((bsz, 1, n), jnp.float32)
    else:
        # PyTorch in_mask is (n, b); 1 = do not attend
        mask_b = jnp.transpose(in_mask.astype(jnp.float32), (1, 0)).reshape(bsz, 1, n)

    # Query tiling (single tile for small m; keeps VMEM bounded for long m).
    tm = m if m <= 256 else 256
    num_m = pl.cdiv(m, tm)

    kernel = functools.partial(_mha_kernel,
                               scale=1.0 / sqrt(E),   # module scales by sqrt(embed_dim)
                               causal=causal_masking,
                               n_heads=n_heads,
                               head_dim=d)

    grid_spec = pltpu.PrefetchScalarGridSpec(
        num_scalar_prefetch=0,
        grid=(bsz, num_m),
        in_specs=[
            pl.BlockSpec((1, tm, E), lambda b, i: (b, i, 0)),   # q
            pl.BlockSpec((1, n, E), lambda b, i: (b, 0, 0)),    # k
            pl.BlockSpec((1, n, E), lambda b, i: (b, 0, 0)),    # v
            pl.BlockSpec((E, E), lambda b, i: (0, 0)),          # Wq (resident, DMA'd once)
            pl.BlockSpec((E, E), lambda b, i: (0, 0)),          # Wk
            pl.BlockSpec((E, E), lambda b, i: (0, 0)),          # Wv
            pl.BlockSpec((E, E), lambda b, i: (0, 0)),          # Wo
            pl.BlockSpec((4, E), lambda b, i: (0, 0)),          # packed biases
            pl.BlockSpec((1, 1, n), lambda b, i: (b, 0, 0)),    # padding mask
        ],
        out_specs=pl.BlockSpec((1, tm, E), lambda b, i: (b, i, 0)),
    )

    out_b = pl.pallas_call(
        kernel,
        out_shape=jax.ShapeDtypeStruct((bsz, m, E), jnp.float32),
        grid_spec=grid_spec,
        compiler_params=pltpu.CompilerParams(
            dimension_semantics=("parallel", "parallel"),
            # raised above the 32 MiB default, comfortably under v7x's 64 MiB physical
            vmem_limit_bytes=48 * 1024 * 1024),
    )(q_b, k_b, v_b, wq, wk, wv, wo, biases, mask_b)

    # (batch, m, E) -> (m, batch, E) to match the PyTorch output convention
    return jnp.transpose(out_b, (1, 0, 2))


# ----------------------------------------------------------------------------
# Plain-JAX reference (mirrors the PyTorch forward exactly) for validation
# ----------------------------------------------------------------------------
def mha_reference(queries, keys, values, params, n_heads,
                  in_mask=None, causal_masking=False):
    m, bsz, E = queries.shape
    n = keys.shape[0]
    d = E // n_heads

    def lin(x, wb):
        w, b = wb
        return x @ w.T + b

    q = lin(queries, params["query"]).reshape(m, bsz, n_heads, d)
    k = lin(keys, params["key"]).reshape(n, bsz, n_heads, d)
    v = lin(values, params["value"]).reshape(n, bsz, n_heads, d)

    scores = jnp.einsum("mbhd,nbhd->mnbh", q, k) / sqrt(E)
    if in_mask is not None:
        mask = in_mask.astype(bool).reshape(1, n, bsz, 1)
        scores = jnp.where(mask, NEG_INF, scores)
    if causal_masking:
        cmask = (jnp.triu(jnp.ones((m, n)), k=1) == 1).reshape(m, n, 1, 1)
        scores = jnp.where(cmask, NEG_INF, scores)
    weights = jax.nn.softmax(scores, axis=1)
    pooled = jnp.einsum("mnbh,nbhd->mbhd", weights, v).reshape(m, bsz, E)
    return lin(pooled, params["output"])


if __name__ == "__main__":
    embed_dim, n_heads = 32, 4
    m, n, bsz = 8, 8, 2

    key = jax.random.PRNGKey(0)
    kp, kq, kk, kv, km = jax.random.split(key, 5)

    params = init_mha_params(kp, embed_dim, n_heads)
    queries = jax.random.normal(kq, (m, bsz, embed_dim), jnp.float32)
    keys = jax.random.normal(kk, (n, bsz, embed_dim), jnp.float32)
    values = jax.random.normal(kv, (n, bsz, embed_dim), jnp.float32)
    # padding mask (n, bsz): mask out the last two key positions of batch 1
    in_mask = jnp.zeros((n, bsz), jnp.int32).at[-2:, 1].set(1)

    out = multi_head_attention(queries, keys, values, params, n_heads,
                               in_mask=in_mask, causal_masking=True)
    out = jax.block_until_ready(out)

    ref = mha_reference(queries, keys, values, params, n_heads,
                        in_mask=in_mask, causal_masking=True)

    assert out.shape == (m, bsz, embed_dim)
    assert jnp.allclose(out, ref, atol=1e-4, rtol=1e-4)
    print("KERNEL_OK")
</pallas_src>

<mosaic_0001>
module attributes {stable_mosaic.version = 11 : i64} {
  func.func @_mha_kernel(%arg0: i32, %arg1: i32, %arg2: memref<1x8x32xf32, #tpu.memory_space<vmem>>, %arg3: memref<1x8x32xf32, #tpu.memory_space<vmem>>, %arg4: memref<1x8x32xf32, #tpu.memory_space<vmem>>, %arg5: memref<32x32xf32, #tpu.memory_space<vmem>>, %arg6: memref<32x32xf32, #tpu.memory_space<vmem>>, %arg7: memref<32x32xf32, #tpu.memory_space<vmem>>, %arg8: memref<32x32xf32, #tpu.memory_space<vmem>>, %arg9: memref<4x32xf32, #tpu.memory_space<vmem>>, %arg10: memref<1x1x8xf32, #tpu.memory_space<vmem>>, %arg11: memref<1x8x32xf32, #tpu.memory_space<vmem>>) attributes {dimension_semantics = [#tpu.dimension_semantics<parallel>, #tpu.dimension_semantics<parallel>], iteration_bounds = array<i64: 2, 1>, scalar_prefetch = 0 : i64, scratch_operands = 0 : i64, tpu.core_type = #tpu.core_type<tc>, window_params = [{transform_indices = @transform_0, window_bounds = array<i64: 1, 8, 32>}, {transform_indices = @transform_1, window_bounds = array<i64: 1, 8, 32>}, {transform_indices = @transform_2, window_bounds = array<i64: 1, 8, 32>}, {pipeline_mode = #tpu.pipeline_mode<synchronous>, transform_indices = @transform_3, window_bounds = array<i64: 32, 32>}, {pipeline_mode = #tpu.pipeline_mode<synchronous>, transform_indices = @transform_4, window_bounds = array<i64: 32, 32>}, {pipeline_mode = #tpu.pipeline_mode<synchronous>, transform_indices = @transform_5, window_bounds = array<i64: 32, 32>}, {pipeline_mode = #tpu.pipeline_mode<synchronous>, transform_indices = @transform_6, window_bounds = array<i64: 32, 32>}, {pipeline_mode = #tpu.pipeline_mode<synchronous>, transform_indices = @transform_7, window_bounds = array<i64: 4, 32>}, {transform_indices = @transform_8, window_bounds = array<i64: 1, 1, 8>}, {transform_indices = @transform_9, window_bounds = array<i64: 1, 8, 32>}]} {
    %c0 = arith.constant 0 : index
    %c0_0 = arith.constant 0 : index
    %c0_1 = arith.constant 0 : index
    %0 = vector.load %arg2[%c0, %c0_0, %c0_1] : memref<1x8x32xf32, #tpu.memory_space<vmem>>, vector<1x8x32xf32>
    %1 = vector.shape_cast %0 : vector<1x8x32xf32> to vector<8x32xf32>
    %c0_2 = arith.constant 0 : index
    %c0_3 = arith.constant 0 : index
    %c0_4 = arith.constant 0 : index
    %2 = vector.load %arg3[%c0_2, %c0_3, %c0_4] : memref<1x8x32xf32, #tpu.memory_space<vmem>>, vector<1x8x32xf32>
    %3 = vector.shape_cast %2 : vector<1x8x32xf32> to vector<8x32xf32>
    %c0_5 = arith.constant 0 : index
    %c0_6 = arith.constant 0 : index
    %c0_7 = arith.constant 0 : index
    %4 = vector.load %arg4[%c0_5, %c0_6, %c0_7] : memref<1x8x32xf32, #tpu.memory_space<vmem>>, vector<1x8x32xf32>
    %5 = vector.shape_cast %4 : vector<1x8x32xf32> to vector<8x32xf32>
    %c0_8 = arith.constant 0 : index
    %c0_9 = arith.constant 0 : index
    %6 = vector.load %arg5[%c0_8, %c0_9] : memref<32x32xf32, #tpu.memory_space<vmem>>, vector<32x32xf32>
    %cst = arith.constant dense<0.000000e+00> : vector<8x32xf32>
    %7 = tpu.matmul %1, %6, %cst {dimension_numbers = #tpu.dot_dimension_numbers<[1], [1], [0], [0], [0, 0, 1, 0], [], []>} : vector<8x32xf32>, vector<32x32xf32>, vector<8x32xf32> -> vector<8x32xf32>
    %c0_10 = arith.constant 0 : index
    %c0_11 = arith.constant 0 : index
    %8 = vector.load %arg9[%c0_10, %c0_11] : memref<4x32xf32, #tpu.memory_space<vmem>>, vector<1x32xf32>
    %9 = vector.broadcast %8 : vector<1x32xf32> to vector<8x32xf32>
    %10 = arith.addf %7, %9 : vector<8x32xf32>
    %c0_12 = arith.constant 0 : index
    %c0_13 = arith.constant 0 : index
    %11 = vector.load %arg6[%c0_12, %c0_13] : memref<32x32xf32, #tpu.memory_space<vmem>>, vector<32x32xf32>
    %cst_14 = arith.constant dense<0.000000e+00> : vector<8x32xf32>
    %12 = tpu.matmul %3, %11, %cst_14 {dimension_numbers = #tpu.dot_dimension_numbers<[1], [1], [0], [0], [0, 0, 1, 0], [], []>} : vector<8x32xf32>, vector<32x32xf32>, vector<8x32xf32> -> vector<8x32xf32>
    %c1 = arith.constant 1 : index
    %c0_15 = arith.constant 0 : index
    %13 = vector.load %arg9[%c1, %c0_15] : memref<4x32xf32, #tpu.memory_space<vmem>>, vector<1x32xf32>
    %14 = vector.broadcast %13 : vector<1x32xf32> to vector<8x32xf32>
    %15 = arith.addf %12, %14 : vector<8x32xf32>
    %c0_16 = arith.constant 0 : index
    %c0_17 = arith.constant 0 : index
    %16 = vector.load %arg7[%c0_16, %c0_17] : memref<32x32xf32, #tpu.memory_space<vmem>>, vector<32x32xf32>
    %cst_18 = arith.constant dense<0.000000e+00> : vector<8x32xf32>
    %17 = tpu.matmul %5, %16, %cst_18 {dimension_numbers = #tpu.dot_dimension_numbers<[1], [1], [0], [0], [0, 0, 1, 0], [], []>} : vector<8x32xf32>, vector<32x32xf32>, vector<8x32xf32> -> vector<8x32xf32>
    %c2 = arith.constant 2 : index
    %c0_19 = arith.constant 0 : index
    %18 = vector.load %arg9[%c2, %c0_19] : memref<4x32xf32, #tpu.memory_space<vmem>>, vector<1x32xf32>
    %19 = vector.broadcast %18 : vector<1x32xf32> to vector<8x32xf32>
    %20 = arith.addf %17, %19 : vector<8x32xf32>
    %c0_20 = arith.constant 0 : index
    %c0_21 = arith.constant 0 : index
    %c0_22 = arith.constant 0 : index
    %21 = vector.load %arg10[%c0_20, %c0_21, %c0_22] : memref<1x1x8xf32, #tpu.memory_space<vmem>>, vector<1x1x8xf32>
    %22 = vector.shape_cast %21 : vector<1x1x8xf32> to vector<1x8xf32>
    %cst_23 = arith.constant 5.000000e-01 : f32
    %23 = vector.broadcast %cst_23 : f32 to vector<1x8xf32>
    %24 = arith.cmpf ogt, %22, %23 : vector<1x8xf32>
    %c8_i32 = arith.constant 8 : i32
    %25 = arith.muli %arg1, %c8_i32 : i32
    %26 = tpu.iota {dimensions = array<i32: 0>} : vector<8x8xi32>
    %27 = vector.broadcast %25 : i32 to vector<8x8xi32>
    %28 = arith.addi %27, %26 : vector<8x8xi32>
    %29 = tpu.iota {dimensions = array<i32: 1>} : vector<8x8xi32>
    %30 = arith.cmpi sgt, %29, %28 : vector<8x8xi32>
    %31 = vector.broadcast %24 : vector<1x8xi1> to vector<8x8xi1>
    %32 = arith.ori %31, %30 : vector<8x8xi1>
    %33 = vector.extract_strided_slice %10 {offsets = [0, 0], sizes = [8, 8], strides = [1, 1]} : vector<8x32xf32> to vector<8x8xf32>
    %34 = vector.extract_strided_slice %15 {offsets = [0, 0], sizes = [8, 8], strides = [1, 1]} : vector<8x32xf32> to vector<8x8xf32>
    %cst_24 = arith.constant dense<0.000000e+00> : vector<8x8xf32>
    %35 = tpu.matmul %33, %34, %cst_24 {dimension_numbers = #tpu.dot_dimension_numbers<[1], [1], [0], [0], [0, 0, 1, 0], [], []>} : vector<8x8xf32>, vector<8x8xf32>, vector<8x8xf32> -> vector<8x8xf32>
    %cst_25 = arith.constant 0.176776692 : f32
    %36 = vector.broadcast %cst_25 : f32 to vector<8x8xf32>
    %37 = arith.mulf %35, %36 : vector<8x8xf32>
    %cst_26 = arith.constant -1.000000e+05 : f32
    %38 = vector.broadcast %cst_26 : f32 to vector<8x8xf32>
    %39 = arith.select %32, %38, %37 : vector<8x8xi1>, vector<8x8xf32>
    %cst_27 = arith.constant dense<0xFF800000> : vector<8xf32>
    %40 = vector.multi_reduction <maximumf>, %39, %cst_27 [1] : vector<8x8xf32> to vector<8xf32>
    %41 = vector.shape_cast %40 : vector<8xf32> to vector<8x1xf32>
    %42 = vector.broadcast %41 : vector<8x1xf32> to vector<8x8xf32>
    %43 = arith.subf %39, %42 : vector<8x8xf32>
    %44 = math.exp %43 : vector<8x8xf32>
    %cst_28 = arith.constant dense<0.000000e+00> : vector<8xf32>
    %45 = vector.multi_reduction <add>, %44, %cst_28 [1] : vector<8x8xf32> to vector<8xf32>
    %46 = vector.shape_cast %45 : vector<8xf32> to vector<8x1xf32>
    %47 = tpu.reciprocal %46 {approx = true} : vector<8x1xf32> -> vector<8x1xf32>
    %48 = arith.mulf %46, %47 : vector<8x1xf32>
    %cst_29 = arith.constant 2.000000e+00 : f32
    %49 = vector.broadcast %cst_29 : f32 to vector<8x1xf32>
    %50 = arith.subf %49, %48 : vector<8x1xf32>
    %51 = arith.mulf %47, %50 : vector<8x1xf32>
    %52 = vector.broadcast %51 : vector<8x1xf32> to vector<8x8xf32>
    %53 = arith.mulf %44, %52 : vector<8x8xf32>
    %54 = vector.extract_strided_slice %20 {offsets = [0, 0], sizes = [8, 8], strides = [1, 1]} : vector<8x32xf32> to vector<8x8xf32>
    %cst_30 = arith.constant dense<0.000000e+00> : vector<8x8xf32>
    %55 = tpu.matmul %53, %54, %cst_30 {dimension_numbers = #tpu.dot_dimension_numbers<[1], [0], [0], [1], [0, 0, 1, 1], [], []>} : vector<8x8xf32>, vector<8x8xf32>, vector<8x8xf32> -> vector<8x8xf32>
    %56 = vector.extract_strided_slice %10 {offsets = [0, 8], sizes = [8, 8], strides = [1, 1]} : vector<8x32xf32> to vector<8x8xf32>
    %57 = vector.extract_strided_slice %15 {offsets = [0, 8], sizes = [8, 8], strides = [1, 1]} : vector<8x32xf32> to vector<8x8xf32>
    %cst_31 = arith.constant dense<0.000000e+00> : vector<8x8xf32>
    %58 = tpu.matmul %56, %57, %cst_31 {dimension_numbers = #tpu.dot_dimension_numbers<[1], [1], [0], [0], [0, 0, 1, 0], [], []>} : vector<8x8xf32>, vector<8x8xf32>, vector<8x8xf32> -> vector<8x8xf32>
    %cst_32 = arith.constant 0.176776692 : f32
    %59 = vector.broadcast %cst_32 : f32 to vector<8x8xf32>
    %60 = arith.mulf %58, %59 : vector<8x8xf32>
    %cst_33 = arith.constant -1.000000e+05 : f32
    %61 = vector.broadcast %cst_33 : f32 to vector<8x8xf32>
    %62 = arith.select %32, %61, %60 : vector<8x8xi1>, vector<8x8xf32>
    %cst_34 = arith.constant dense<0xFF800000> : vector<8xf32>
    %63 = vector.multi_reduction <maximumf>, %62, %cst_34 [1] : vector<8x8xf32> to vector<8xf32>
    %64 = vector.shape_cast %63 : vector<8xf32> to vector<8x1xf32>
    %65 = vector.broadcast %64 : vector<8x1xf32> to vector<8x8xf32>
    %66 = arith.subf %62, %65 : vector<8x8xf32>
    %67 = math.exp %66 : vector<8x8xf32>
    %cst_35 = arith.constant dense<0.000000e+00> : vector<8xf32>
    %68 = vector.multi_reduction <add>, %67, %cst_35 [1] : vector<8x8xf32> to vector<8xf32>
    %69 = vector.shape_cast %68 : vector<8xf32> to vector<8x1xf32>
    %70 = tpu.reciprocal %69 {approx = true} : vector<8x1xf32> -> vector<8x1xf32>
    %71 = arith.mulf %69, %70 : vector<8x1xf32>
    %cst_36 = arith.constant 2.000000e+00 : f32
    %72 = vector.broadcast %cst_36 : f32 to vector<8x1xf32>
    %73 = arith.subf %72, %71 : vector<8x1xf32>
    %74 = arith.mulf %70, %73 : vector<8x1xf32>
    %75 = vector.broadcast %74 : vector<8x1xf32> to vector<8x8xf32>
    %76 = arith.mulf %67, %75 : vector<8x8xf32>
    %77 = vector.extract_strided_slice %20 {offsets = [0, 8], sizes = [8, 8], strides = [1, 1]} : vector<8x32xf32> to vector<8x8xf32>
    %cst_37 = arith.constant dense<0.000000e+00> : vector<8x8xf32>
    %78 = tpu.matmul %76, %77, %cst_37 {dimension_numbers = #tpu.dot_dimension_numbers<[1], [0], [0], [1], [0, 0, 1, 1], [], []>} : vector<8x8xf32>, vector<8x8xf32>, vector<8x8xf32> -> vector<8x8xf32>
    %79 = vector.extract_strided_slice %10 {offsets = [0, 16], sizes = [8, 8], strides = [1, 1]} : vector<8x32xf32> to vector<8x8xf32>
    %80 = vector.extract_strided_slice %15 {offsets = [0, 16], sizes = [8, 8], strides = [1, 1]} : vector<8x32xf32> to vector<8x8xf32>
    %cst_38 = arith.constant dense<0.000000e+00> : vector<8x8xf32>
    %81 = tpu.matmul %79, %80, %cst_38 {dimension_numbers = #tpu.dot_dimension_numbers<[1], [1], [0], [0], [0, 0, 1, 0], [], []>} : vector<8x8xf32>, vector<8x8xf32>, vector<8x8xf32> -> vector<8x8xf32>
    %cst_39 = arith.constant 0.176776692 : f32
    %82 = vector.broadcast %cst_39 : f32 to vector<8x8xf32>
    %83 = arith.mulf %81, %82 : vector<8x8xf32>
    %cst_40 = arith.constant -1.000000e+05 : f32
    %84 = vector.broadcast %cst_40 : f32 to vector<8x8xf32>
    %85 = arith.select %32, %84, %83 : vector<8x8xi1>, vector<8x8xf32>
    %cst_41 = arith.constant dense<0xFF800000> : vector<8xf32>
    %86 = vector.multi_reduction <maximumf>, %85, %cst_41 [1] : vector<8x8xf32> to vector<8xf32>
    %87 = vector.shape_cast %86 : vector<8xf32> to vector<8x1xf32>
    %88 = vector.broadcast %87 : vector<8x1xf32> to vector<8x8xf32>
    %89 = arith.subf %85, %88 : vector<8x8xf32>
    %90 = math.exp %89 : vector<8x8xf32>
    %cst_42 = arith.constant dense<0.000000e+00> : vector<8xf32>
    %91 = vector.multi_reduction <add>, %90, %cst_42 [1] : vector<8x8xf32> to vector<8xf32>
    %92 = vector.shape_cast %91 : vector<8xf32> to vector<8x1xf32>
    %93 = tpu.reciprocal %92 {approx = true} : vector<8x1xf32> -> vector<8x1xf32>
    %94 = arith.mulf %92, %93 : vector<8x1xf32>
    %cst_43 = arith.constant 2.000000e+00 : f32
    %95 = vector.broadcast %cst_43 : f32 to vector<8x1xf32>
    %96 = arith.subf %95, %94 : vector<8x1xf32>
    %97 = arith.mulf %93, %96 : vector<8x1xf32>
    %98 = vector.broadcast %97 : vector<8x1xf32> to vector<8x8xf32>
    %99 = arith.mulf %90, %98 : vector<8x8xf32>
    %100 = vector.extract_strided_slice %20 {offsets = [0, 16], sizes = [8, 8], strides = [1, 1]} : vector<8x32xf32> to vector<8x8xf32>
    %cst_44 = arith.constant dense<0.000000e+00> : vector<8x8xf32>
    %101 = tpu.matmul %99, %100, %cst_44 {dimension_numbers = #tpu.dot_dimension_numbers<[1], [0], [0], [1], [0, 0, 1, 1], [], []>} : vector<8x8xf32>, vector<8x8xf32>, vector<8x8xf32> -> vector<8x8xf32>
    %102 = vector.extract_strided_slice %10 {offsets = [0, 24], sizes = [8, 8], strides = [1, 1]} : vector<8x32xf32> to vector<8x8xf32>
    %103 = vector.extract_strided_slice %15 {offsets = [0, 24], sizes = [8, 8], strides = [1, 1]} : vector<8x32xf32> to vector<8x8xf32>
    %cst_45 = arith.constant dense<0.000000e+00> : vector<8x8xf32>
    %104 = tpu.matmul %102, %103, %cst_45 {dimension_numbers = #tpu.dot_dimension_numbers<[1], [1], [0], [0], [0, 0, 1, 0], [], []>} : vector<8x8xf32>, vector<8x8xf32>, vector<8x8xf32> -> vector<8x8xf32>
    %cst_46 = arith.constant 0.176776692 : f32
    %105 = vector.broadcast %cst_46 : f32 to vector<8x8xf32>
    %106 = arith.mulf %104, %105 : vector<8x8xf32>
    %cst_47 = arith.constant -1.000000e+05 : f32
    %107 = vector.broadcast %cst_47 : f32 to vector<8x8xf32>
    %108 = arith.select %32, %107, %106 : vector<8x8xi1>, vector<8x8xf32>
    %cst_48 = arith.constant dense<0xFF800000> : vector<8xf32>
    %109 = vector.multi_reduction <maximumf>, %108, %cst_48 [1] : vector<8x8xf32> to vector<8xf32>
    %110 = vector.shape_cast %109 : vector<8xf32> to vector<8x1xf32>
    %111 = vector.broadcast %110 : vector<8x1xf32> to vector<8x8xf32>
    %112 = arith.subf %108, %111 : vector<8x8xf32>
    %113 = math.exp %112 : vector<8x8xf32>
    %cst_49 = arith.constant dense<0.000000e+00> : vector<8xf32>
    %114 = vector.multi_reduction <add>, %113, %cst_49 [1] : vector<8x8xf32> to vector<8xf32>
    %115 = vector.shape_cast %114 : vector<8xf32> to vector<8x1xf32>
    %116 = tpu.reciprocal %115 {approx = true} : vector<8x1xf32> -> vector<8x1xf32>
    %117 = arith.mulf %115, %116 : vector<8x1xf32>
    %cst_50 = arith.constant 2.000000e+00 : f32
    %118 = vector.broadcast %cst_50 : f32 to vector<8x1xf32>
    %119 = arith.subf %118, %117 : vector<8x1xf32>
    %120 = arith.mulf %116, %119 : vector<8x1xf32>
    %121 = vector.broadcast %120 : vector<8x1xf32> to vector<8x8xf32>
    %122 = arith.mulf %113, %121 : vector<8x8xf32>
    %123 = vector.extract_strided_slice %20 {offsets = [0, 24], sizes = [8, 8], strides = [1, 1]} : vector<8x32xf32> to vector<8x8xf32>
    %cst_51 = arith.constant dense<0.000000e+00> : vector<8x8xf32>
    %124 = tpu.matmul %122, %123, %cst_51 {dimension_numbers = #tpu.dot_dimension_numbers<[1], [0], [0], [1], [0, 0, 1, 1], [], []>} : vector<8x8xf32>, vector<8x8xf32>, vector<8x8xf32> -> vector<8x8xf32>
    %125 = tpu.concatenate %55, %78, %101, %124 in 1 : vector<8x8xf32>, vector<8x8xf32>, vector<8x8xf32>, vector<8x8xf32> -> vector<8x32xf32>
    %c0_52 = arith.constant 0 : index
    %c0_53 = arith.constant 0 : index
    %126 = vector.load %arg8[%c0_52, %c0_53] : memref<32x32xf32, #tpu.memory_space<vmem>>, vector<32x32xf32>
    %cst_54 = arith.constant dense<0.000000e+00> : vector<8x32xf32>
    %127 = tpu.matmul %125, %126, %cst_54 {dimension_numbers = #tpu.dot_dimension_numbers<[1], [1], [0], [0], [0, 0, 1, 0], [], []>} : vector<8x32xf32>, vector<32x32xf32>, vector<8x32xf32> -> vector<8x32xf32>
    %c3 = arith.constant 3 : index
    %c0_55 = arith.constant 0 : index
    %128 = vector.load %arg9[%c3, %c0_55] : memref<4x32xf32, #tpu.memory_space<vmem>>, vector<1x32xf32>
    %129 = vector.broadcast %128 : vector<1x32xf32> to vector<8x32xf32>
    %130 = arith.addf %127, %129 : vector<8x32xf32>
    %c0_56 = arith.constant 0 : index
    %c0_57 = arith.constant 0 : index
    %c0_58 = arith.constant 0 : index
    %131 = vector.load %arg11[%c0_56, %c0_57, %c0_58] : memref<1x8x32xf32, #tpu.memory_space<vmem>>, vector<1x8x32xf32>
    %132 = vector.shape_cast %131 : vector<1x8x32xf32> to vector<8x32xf32>
    %133 = vector.shape_cast %130 : vector<8x32xf32> to vector<1x8x32xf32>
    tpu.vector_store %arg11[%c0_56, %c0_57, %c0_58], %133 {strides = array<i32>} : memref<1x8x32xf32, #tpu.memory_space<vmem>>, vector<1x8x32xf32>,
    return
  }
  func.func @transform_0(%arg0: i32, %arg1: i32) -> (i32, i32, i32) {
    %c0_i32 = arith.constant 0 : i32
    %c0_i32_0 = arith.constant 0 : i32
    return %arg0, %arg1, %c0_i32 : i32, i32, i32
  }
  func.func @transform_1(%arg0: i32, %arg1: i32) -> (i32, i32, i32) {
    %c0_i32 = arith.constant 0 : i32
    %c0_i32_0 = arith.constant 0 : i32
    %c0_i32_1 = arith.constant 0 : i32
    return %arg0, %c0_i32, %c0_i32_0 : i32, i32, i32
  }
  func.func @transform_2(%arg0: i32, %arg1: i32) -> (i32, i32, i32) {
    %c0_i32 = arith.constant 0 : i32
    %c0_i32_0 = arith.constant 0 : i32
    %c0_i32_1 = arith.constant 0 : i32
    return %arg0, %c0_i32, %c0_i32_0 : i32, i32, i32
  }
  func.func @transform_3(%arg0: i32, %arg1: i32) -> (i32, i32) {
    %c0_i32 = arith.constant 0 : i32
    %c0_i32_0 = arith.constant 0 : i32
    %c0_i32_1 = arith.constant 0 : i32
    return %c0_i32, %c0_i32_0 : i32, i32
  }
  func.func @transform_4(%arg0: i32, %arg1: i32) -> (i32, i32) {
    %c0_i32 = arith.constant 0 : i32
    %c0_i32_0 = arith.constant 0 : i32
    %c0_i32_1 = arith.constant 0 : i32
    return %c0_i32, %c0_i32_0 : i32, i32
  }
  func.func @transform_5(%arg0: i32, %arg1: i32) -> (i32, i32) {
    %c0_i32 = arith.constant 0 : i32
    %c0_i32_0 = arith.constant 0 : i32
    %c0_i32_1 = arith.constant 0 : i32
    return %c0_i32, %c0_i32_0 : i32, i32
  }
  func.func @transform_6(%arg0: i32, %arg1: i32) -> (i32, i32) {
    %c0_i32 = arith.constant 0 : i32
    %c0_i32_0 = arith.constant 0 : i32
    %c0_i32_1 = arith.constant 0 : i32
    return %c0_i32, %c0_i32_0 : i32, i32
  }
  func.func @transform_7(%arg0: i32, %arg1: i32) -> (i32, i32) {
    %c0_i32 = arith.constant 0 : i32
    %c0_i32_0 = arith.constant 0 : i32
    %c0_i32_1 = arith.constant 0 : i32
    return %c0_i32, %c0_i32_0 : i32, i32
  }
  func.func @transform_8(%arg0: i32, %arg1: i32) -> (i32, i32, i32) {
    %c0_i32 = arith.constant 0 : i32
    %c0_i32_0 = arith.constant 0 : i32
    %c0_i32_1 = arith.constant 0 : i32
    return %arg0, %c0_i32, %c0_i32_0 : i32, i32, i32
  }
  func.func @transform_9(%arg0: i32, %arg1: i32) -> (i32, i32, i32) {
    %c0_i32 = arith.constant 0 : i32
    %c0_i32_0 = arith.constant 0 : i32
    return %arg0, %arg1, %c0_i32 : i32, i32, i32
  }
}

</mosaic_0001>

<bundles_post_ra>
// kernel: tpu_custom_call.1
= control target key start
LH: loop header
LB: loop body
LE: loop exit
PB: predicated region body
PF: predicated region fallthrough
CT: control target
= control target key end

     0   :  { %s2872_s0 = inlined_call_operand.hbm [shape: f32[2,8,32], index: 0, kind: input, shape index: {}]   ;;  %s2873_s1 = inlined_call_operand.hbm [shape: f32[2,8,32], index: 1, kind: input, shape index: {}]   ;;  %s2874_s2 = inlined_call_operand.hbm [shape: f32[2,8,32], index: 2, kind: input, shape index: {}]   ;;  %s2875_s3 = inlined_call_operand.hbm [shape: f32[32,32], index: 3, kind: input, shape index: {}]   ;;  %s2876_s4 = inlined_call_operand.hbm [shape: f32[32,32], index: 4, kind: input, shape index: {}]   ;;  %s2877_s5 = inlined_call_operand.hbm [shape: f32[32,32], index: 5, kind: input, shape index: {}]   ;;  %s2878_s6 = inlined_call_operand.hbm [shape: f32[32,32], index: 6, kind: input, shape index: {}]   ;;  %s2879_s7 = inlined_call_operand.vmem [shape: f32[4,32], index: 7, kind: input, shape index: {}]   ;;  %s2880_s8 = inlined_call_operand.vmem [shape: f32[2,1,8], index: 8, kind: input, shape index: {}]   ;;  %s2881_s9 = inlined_call_operand.hbm [shape: f32[2,8,32], index: 9, kind: output, shape index: {}]  }
   0x1   :  { %2898 = sst [smem:[#allocation26_spill]] %s2873_s1 }
   0x2   :  { %2899 = sst [smem:[#allocation27_spill]] %s2875_s3 }
   0x3   :  { %2900 = sst [smem:[#allocation28_spill]] %s2876_s4 }
   0x4   :  { %2901 = sst [smem:[#allocation29_spill]] %s2877_s5 }
   0x5   :  { %2902 = sst [smem:[#allocation30_spill]] %s2881_s9 }
   0x6   :  { %14 = vsyncpa [#allocation3], 0 }
   0x7   :  { %16 = vsyncpa [#allocation3 + $0x1], 0 }
   0x8   :  { %17 = vsyncpa [#allocation6], 0 }
   0x9   :  { %19 = vsyncpa [#allocation6 + $0x1], 0 }
   0xa   :  { %20 = vsyncpa [#allocation9], 0 }
   0xb   :  { %21 = vsyncpa [#allocation12], 0 }
   0xc   :  { %22 = vsyncpa [#allocation4], 0 }
   0xd   :  { %24 = vsyncpa [#allocation4 + $0x1], 0  ;;  %s2459_s30 = smov 0   ;;  %s2461_s10 = smov 0  }
   0xe   :  { %s2463_s11 = smov 0   ;;  %s2465_s12 = smov 0  }
   0xf   :  { %s2467_s13 = smov 0   ;;  %s2469_s14 = smov 0  }
  0x10 LB: > { %2903 = sst [smem:[#allocation20_spill]] %s2368_s30  ;;  %s2490_s15 = sadd.s32 4294967295, %s2388_s14   ;;  %s2388_s14 = sphi %s2469_s14, %s30_s14   ;;  %s2384_s13 = sphi %s2467_s13, %s2942_s13   ;;  %s2380_s12 = sphi %s2465_s12, %s2941_s12   ;;  %s2376_s11 = sphi %s2463_s11, %s2945_s11   ;;  %s2372_s10 = sphi %s2461_s10, %s2944_s10   ;;  %s2368_s30 = sphi %s2459_s30, %s2943_s30  }
  0x11   : > { %2904 = sst [smem:[#allocation21_spill]] %s2384_s13  ;;  %p1787_p0 = scmp.ge.s32.totalorder %s2388_s14, 1 }
  0x12   : > { %2905 = sst [smem:[#allocation22_spill]] %s2388_s14  ;;  %p2892_p1 = scmp.eq.s32.totalorder %s2490_s15, 0 }
  0x13   : > { %p286_p2 = scmp.lt.s32.totalorder %s2388_s14, 3  ;;  %s2390_s17 = smov [#allocation8]  }
  0x14   : > { %s298_s18 = sshll.u32 %s2390_s17, 4  ;;  %s2391_s20 = smov [#allocation11]   ;;  %s299_s18 = int_to_ptr.vmem [resolvable:$true] %s298_s18 }
  0x15   : > { %p2495_p3 = pnand %p1787_p0, %p286_p2  ;;  %s324_s21 = sshll.u32 %s2391_s20, 4  ;;  %s325_s21 = int_to_ptr.vmem [resolvable:$true] %s324_s21 }
  0x16   : > { %s2119_s22 = scalar_lea.vmem %s299_s18, 512  ;;  %p2127_p11 = scmp.lt.s32.totalorder %s299_s18, %s299_s18 }
  0x17   : > { %p1992_p4 = pneg %p2495_p3  ;;  %p2120_p8 = scmp.ne.s32.totalorder %s299_s18, %s2119_s22 }
  0x18   : > { %p2128_p12 = scmp.lt.s32.totalorder %s2119_s22, %s2119_s22 }
  0x19   : > { %p2504_p6 = pnand %p1992_p4, %p2892_p1 }
  0x1a   : > { %p2129_p13 = por %p2128_p12, %p2127_p11 }
  0x1b   : > { %p2893_p7 = pneg %p2504_p6 }
  0x1d   : > { %p2122_p9 = pnand %p2120_p8, %p2893_p7 }
  0x1f   : > { %p2123_p10 = pneg %p2122_p9 }
  0x21   : > { %p2130_p0 = pnand %p2129_p13, %p2123_p10 }
  0x23   : > { %2133 = shalt.err (!%p2130_p0)
}
  0x24   : > { %s2882_s23 = smov 128   ;;  %s2884_s24 = smov 8  }
  0x25   : > { %s2908_s3 = sld [smem:[#allocation27_spill]]  ;;  %s2145_s27 = scalar_lea.vmem %s325_s21, 512 }
  0x26   : > { %p2146_p2 = scmp.ne.s32.totalorder %s325_s21, %s2145_s27  ;;  %p2153_p9 = scmp.lt.s32.totalorder %s325_s21, %s325_s21 }
  0x27   : > { %p2154_p10 = scmp.lt.s32.totalorder %s2145_s27, %s2145_s27 }
  0x28   : > { %p2148_p4 = pnand %p2146_p2, %p2893_p7 }
  0x29   : > { %p2155_p11 = por %p2154_p10, %p2153_p9 }
  0x2a   : > { %p2149_p8 = pneg %p2148_p4 }
  0x2b   : > { %1995 = dma.hbm_to_vmem [thread:$0]  (!%p2504_p6), %s2908_s3, 512, %s299_s18, [#allocation9], %s2882_s23, %s2882_s23, %s2884_s24  }
  0x2c   : > { %p2156_p12 = pnand %p2155_p11, %p2149_p8 }
  0x2e   : > { %2159 = shalt.err (!%p2156_p12)
}
  0x2f   : > { %s2909_s5 = sld [smem:[#allocation29_spill]]  ;;  %s1786_s17 = sadd.s32 4294967294, %s2388_s14  }
  0x30   : > { %s42_s18 = sadd.s32 1, %s2384_s13  ;;  %s51_s20 = sadd.s32 1, %s2376_s11 }
  0x31   : > { %p44_p13 = scmp.ge.s32.totalorder %s42_s18, 2  ;;  %p58_p0 = scmp.ne.s32.totalorder %s2376_s11, %s2372_s10 }
  0x32   : > { %p59_p2 = scmp.eq.s32.totalorder %s2388_s14, 0  ;;  %p64_p8 = scmp.ne.s32.totalorder %s2372_s10, %s2368_s30 }
  0x33   : > { %s2947_s18 = smov (%p44_p13, %s42_s18), 0  ;;  %p273_p9 = scmp.eq.s32.totalorder %s2490_s15, 1 }
  0x34   : > { %2910 = sst [smem:[#allocation23_spill]] %s2947_s18  ;;  %p2540_p4 = por %p59_p2, %p58_p0 }
  0x35   : > { %2001 = dma.hbm_to_vmem [thread:$0]  (!%p2504_p6), %s2909_s5, 512, %s325_s21, [#allocation12], %s2882_s23, %s2882_s23, %s2884_s24  }
  0x36   : > { %s46_s21 = ssub.s32 %s2384_s13, %s2947_s18  ;;  %p2551_p11 = por %p2892_p1, %p64_p8 }
  0x37   : > { %p49_p10 = scmp.eq.s32.totalorder %s46_s21, 0  ;;  %p2555_p12 = por %p273_p9, %p58_p0 }
  0x38   : > { %p279_p13 = scmp.eq.s32.totalorder %s1786_s17, 1  ;;  %p2023_p5 = scmp.lt.s32.totalorder %s2388_s14, 2 }
  0x39   : > { %s2913_s26 = scalar_select %p2555_p12, 1, 0 }
  0x3a   : > { %s2560_s27 = scalar_select %p49_p10, %s2376_s11, %s51_s20  }
  0x3b   : > { %p2562_p2 = por %p279_p13, %p64_p8  ;;  %s2888_s29 = sand.u32 1, %s2376_s11  }
  0x3c   : > { %2914 = sst [smem:[#allocation24_spill]] %s2560_s27  ;;  %s2569_s23 = sshll.u32 %s2384_s13, 7 }
  0x3d   : > { %s2915_s28 = scalar_select %p2562_p2, 1, 0 }
  0x3e   : > { %s2573_s21 = sshll.u32 %s2888_s29, 3  ;;  %p2577_p0 = pnand %p2023_p5, %p2540_p4 }
  0x3f   : > { %2916 = sst [smem:[#allocation25_spill]] %s2915_s28  ;;  %s373_s17 = sand.u32 1, %s2388_s14  }
  0x40   : > { %s2918_s1 = sld [smem:[#allocation26_spill]]  ;;  %s377_s18 = scalar_lea.vmem [#allocation5], %s2573_s21 }
  0x41   : > { %s384_s13 = sshll.u32 %s377_s18, 4  ;;  %s2587_s27 = scalar_lea.sflag [#allocation6], %s373_s17  ;;  %s385_s13 = int_to_ptr.vmem [resolvable:$true] %s384_s13 }
  0x42   : > { %p2894_p8 = pneg %p2577_p0  ;;  %s2173_s22 = scalar_lea.vmem %s385_s13, 128 }
  0x43   : > { %p2174_p9 = scmp.ne.s32.totalorder %s385_s13, %s2173_s22  ;;  %s2394_s29 = smov [#allocation5]  }
  0x44   : > { %s2178_s28 = sshll.u32 %s2394_s29, 4  ;;  %s2179_s28 = int_to_ptr.vmem [resolvable:$false] %s2178_s28 }
  0x45   : > { %p2176_p5 = pnand %p2174_p9, %p2894_p8  ;;  %s2180_s14 = scalar_lea.vmem %s2179_s28, 256 }
  0x46   : > { %s382_s5 = scalar_lea.hbm %s2918_s1, %s2569_s23  ;;  %p2181_p10 = scmp.lt.s32.totalorder %s385_s13, %s2179_s28 }
  0x47   : > { %p2177_p4 = pneg %p2176_p5  ;;  %p2182_p13 = scmp.lt.s32.totalorder %s2180_s14, %s2173_s22 }
  0x49   : > { %p2183_p1 = por %p2182_p13, %p2181_p10 }
  0x4b   : > { %p2184_p7 = pnand %p2183_p1, %p2177_p4 }
  0x4d   : > { %2187 = shalt.err (!%p2184_p7)
}
  0x4e   : > { %2011 = dma.hbm_to_vmem [thread:$0]  (!%p2577_p0), %s382_s5, 128, %s385_s13, %s2587_s27  }
  0x4f   : > { %s2395_s3 = smov [#allocation10]   ;;  %s2396_s17 = smov [#allocation13]  }
  0x50   : > { %s311_s18 = sshll.u32 %s2395_s3, 4  ;;  %s337_s20 = sshll.u32 %s2396_s17, 4  ;;  %s312_s18 = int_to_ptr.vmem [resolvable:$true] %s311_s18  ;;  %s338_s20 = int_to_ptr.vmem [resolvable:$true] %s337_s20 }
  0x51   : > { %s2199_s1 = scalar_lea.vmem %s312_s18, 512  ;;  %p2919_p5 = pneg %p2504_p6 }
  0x52   : > { %p2200_p9 = scmp.ne.s32.totalorder %s312_s18, %s2199_s1  ;;  %p2207_p12 = scmp.lt.s32.totalorder %s312_s18, %s312_s18 }
  0x53   : > { %p2208_p10 = scmp.lt.s32.totalorder %s2199_s1, %s2199_s1 }
  0x54   : > { %p2202_p8 = pnand %p2200_p9, %p2919_p5 }
  0x55   : > { %p2209_p1 = por %p2208_p10, %p2207_p12 }
  0x56   : > { %p2203_p2 = pneg %p2202_p8 }
  0x58   : > { %p2210_p7 = pnand %p2209_p1, %p2203_p2 }
  0x5a   : > { %2213 = shalt.err (!%p2210_p7)
}
  0x5b   : > { %s2920_s14 = smov 8   ;;  %s2921_s5 = smov 128  }
  0x5c   : > { %s2922_s4 = sld [smem:[#allocation28_spill]]  ;;  %s2225_s29 = scalar_lea.vmem %s338_s20, 512 }
  0x5d   : > { %p2226_p4 = scmp.ne.s32.totalorder %s338_s20, %s2225_s29  ;;  %p2923_p8 = pmov %p2919_p5 }
  0x5e   : > { %p2233_p12 = scmp.lt.s32.totalorder %s338_s20, %s338_s20  ;;  %p2234_p2 = scmp.lt.s32.totalorder %s2225_s29, %s2225_s29 }
  0x5f   : > { %p2228_p13 = pnand %p2226_p4, %p2923_p8 }
  0x60   : > { %p2235_p5 = por %p2234_p2, %p2233_p12 }
  0x61   : > { %p2229_p9 = pneg %p2228_p13 }
  0x62   : > { %1998 = dma.hbm_to_vmem [thread:$0]  (!%p2504_p6), %s2922_s4, 512, %s312_s18, [#allocation9], %s2921_s5, %s2921_s5, %s2920_s14  }
  0x63   : > { %p2236_p10 = pnand %p2235_p5, %p2229_p9 }
  0x65   : > { %2239 = shalt.err (!%p2236_p10)
}
  0x66   : > { %2004 = dma.hbm_to_vmem [thread:$0]  (!%p2504_p6), %s2878_s6, 512, %s338_s20, [#allocation12], %s2921_s5, %s2921_s5, %s2920_s14  }
  0x67   : > { %s364_s17 = scalar_lea.hbm %s2872_s0, %s2569_s23  ;;  %s358_s13 = scalar_lea.vmem [#allocation2], %s2573_s21 }
  0x68   : > { %s366_s28 = sshll.u32 %s358_s13, 4  ;;  %s400_s4 = scalar_lea.hbm %s2874_s2, %s2569_s23  ;;  %s367_s28 = int_to_ptr.vmem [resolvable:$true] %s366_s28 }
  0x69   : > { %s2924_s30 = sand.u32 1, %s2376_s11   ;;  %s2253_s1 = scalar_lea.vmem %s367_s28, 128 }
  0x6a   : > { %s355_s9 = scalar_lea.sflag [#allocation3], %s2924_s30  ;;  %p2254_p1 = scmp.ne.s32.totalorder %s367_s28, %s2253_s1 }
  0x6b   : > { %p2925_p7 = pneg %p2577_p0  ;;  %s2397_s20 = smov [#allocation2]  }
  0x6c   : > { %s2258_s14 = sshll.u32 %s2397_s20, 4  ;;  %s2259_s14 = int_to_ptr.vmem [resolvable:$false] %s2258_s14 }
  0x6d   : > { %p2256_p4 = pnand %p2254_p1, %p2925_p7  ;;  %s2260_s5 = scalar_lea.vmem %s2259_s14, 256 }
  0x6e   : > { %p2261_p6 = scmp.lt.s32.totalorder %s367_s28, %s2259_s14  ;;  %p2262_p13 = scmp.lt.s32.totalorder %s2260_s5, %s2253_s1 }
  0x6f   : > { %p2257_p8 = pneg %p2256_p4 }
  0x70   : > { %p2263_p9 = por %p2262_p13, %p2261_p6 }
  0x72   : > { %p2264_p12 = pnand %p2263_p9, %p2257_p8 }
  0x74   : > { %2267 = shalt.err (!%p2264_p12)
}
  0x75   : > { %2008 = dma.hbm_to_vmem [thread:$0]  (!%p2577_p0), %s364_s17, 128, %s367_s28, %s355_s9  }
  0x76   : > { %s395_s30 = scalar_lea.vmem [#allocation7], %s2573_s21  ;;  %p2926_p5 = pmov %p2925_p7 }
  0x77   : > { %s402_s22 = sshll.u32 %s395_s30, 4  ;;  %s2398_s18 = smov [#allocation7]   ;;  %s403_s22 = int_to_ptr.vmem [resolvable:$true] %s402_s22 }
  0x78   : > { %s2281_s3 = scalar_lea.vmem %s403_s22, 128  ;;  %s2286_s13 = sshll.u32 %s2398_s18, 4  ;;  %s2287_s13 = int_to_ptr.vmem [resolvable:$false] %s2286_s13 }
  0x79   : > { %p2282_p2 = scmp.ne.s32.totalorder %s403_s22, %s2281_s3  ;;  %s2288_s19 = scalar_lea.vmem %s2287_s13, 256 }
  0x7a   : > { %p2289_p7 = scmp.lt.s32.totalorder %s403_s22, %s2287_s13  ;;  %p2290_p4 = scmp.lt.s32.totalorder %s2288_s19, %s2281_s3 }
  0x7b   : > { %p2284_p10 = pnand %p2282_p2, %p2926_p5 }
  0x7c   : > { %p2291_p8 = por %p2290_p4, %p2289_p7 }
  0x7d   : > { %p2285_p1 = pneg %p2284_p10 }
  0x7f   : > { %p2292_p6 = pnand %p2291_p8, %p2285_p1 }
  0x81   : > { %2295 = shalt.err (!%p2292_p6)
}
  0x82   : > { %2014 = dma.hbm_to_vmem [thread:$0]  (!%p2577_p0), %s400_s4, 128, %s403_s22, %s2587_s27  }
  0x83   : > { %417 = sbr.rel (%p2495_p3) target bundleno = 2948 (0xb84), region = 56  ;;  %s2650_s17 = sand.u32 (!%p2495_p3), 1, %s2372_s10  }
  0x84   : > { %s2653_s28 = sshll.u32 (!%p2495_p3), %s2650_s17, 3  ;;  %s420_s24 = scalar_lea.sflag (!%p2495_p3), [#allocation3], %s2650_s17 }
  0x85   : > { %s423_s29 = scalar_lea.vmem (!%p2495_p3), [#allocation2], %s2653_s28 }
  0x88   : > { %2347 = dma.done.wait (%p2551_p11), %s420_s24, 128  }
  0x89   : > { %2349 = vsyncadd (%p2551_p11), %s420_s24, 4294967168  ;;  %s428_s4 = sand.u32 1, %s2490_s15   ;;  %s432_s23 = scalar_lea.vmem [#allocation5], %s2653_s28 }
  0x8a   : > { %s429_s16 = scalar_lea.sflag [#allocation6], %s428_s4 }
  0x8b   : > { %2351 = dma.done.wait (%p2551_p11), %s429_s16, 256  }
  0x8c   : > { %2353 = vsyncadd (%p2551_p11), %s429_s16, 4294967040  ;;  %s441_s27 = scalar_lea.vmem [#allocation7], %s2653_s28  ;;  %p2927_p3 = scmp.eq.s32.totalorder %s2490_s15, 0 }
  0x8e   : > { %2355 = dma.done.wait (%p2927_p3), [#allocation9], 1024   ;;  %p2928_p0 = pmov %p2927_p3 }
  0x90   : > { %2357 = vsyncadd (%p2928_p0), [#allocation9], 4294966272  ;;  %p2929_p13 = pmov %p2928_p0 }
  0x91   : > { %p2930_p9 = pmov %p2928_p0 }
  0x92   : > { %2359 = dma.done.wait (%p2929_p13), [#allocation12], 1024  }
  0x93   : > { %2361 = vsyncadd (%p2930_p9), [#allocation12], 4294966272  ;;  %v2399_v0 = vmov 0.0   ;;  %vm2400_vm0 = vmmov 0   ;;  %vm520_vm1 = vcmask 261120   ;;  %v609_v1 = vld [vmem:[#allocation10 + $0x18] sm:$0xff]  ;;  %v797_v24 = vlaneseq }
  0x94   : > { %1895 = vmatprep.subr.mxu1 %v2399_v0  ;;  %1884 = vmatprep.subr.mxu0 %v2399_v0  ;;  %v514_v2 = vld [vmem:[#allocation8 + $0x18] sm:$0xff]  ;;  %v608_v3 = vld [vmem:[#allocation10 + $0x10] sm:$0xff]  ;;  %v607_v5 = vld [vmem:[#allocation10 + $0x8] sm:$0xff]  ;;  %vm811_vm2 = vcmask 64512   ;;  %s2401_s14 = smov 120   ;;  %p505_p11 = scmp.lt.s32.totalorder %s2380_s12, 1 }
  0x95   : > { %1903 = vmatprep.mubr.msk.f32.mxu1 %vm2400_vm0, %v2399_v0  ;;  %1892 = vmatprep.mubr.msk.f32.mxu0 %vm2400_vm0, %v2399_v0  ;;  %v513_v4 = vld [vmem:[#allocation8 + $0x10] sm:$0xff]  ;;  %v512_v6 = vld [vmem:[#allocation8 + $0x8] sm:$0xff]  ;;  %v606_v7 = vld [vmem:[#allocation10] sm:$0xff]  ;;  %v798_v26 = vshrl.u32 %v797_v24, 7  ;;  %v2402_v28 = vmov 0   ;;  %v802_v30 = vand.u32 127, %v797_v24 }
  0x96   : > { %1896 = vmatpush3.xpose.msk.msra.mxu1 %vm520_vm1, %v609_v1  ;;  %1885 = vmatpush3.xpose.msk.msra.mxu0 %vm520_vm1, %v514_v2  ;;  %v511_v8 = vld [vmem:[#allocation8] sm:$0xff]  ;;  %v508_v10 = vld [vmem:[%s423_s29] sm:$0xff]  ;;  %v701_v21 = vld [vmem:[#allocation11 + $0x8] sm:$0xff]  ;;  %s506_s5 = scalar_select %p505_p11, %s2380_s12, 1  ;;  %vm1501_vm7 = vcmask 130048   ;;  %vm1503_vm8 = vcmask 195584  }
  0x97   : > { %1897 = vmatprep.subr.mxu1 %v2399_v0  ;;  %1886 = vmatprep.subr.mxu0 %v2399_v0  ;;  %v509_v9 = vld [vmem:[%s432_s23] sm:$0xff]  ;;  %v1814_v11 = vld [vmem:[%s2879_s7 + $0x1] ss:$0 sm:$0xff]  ;;  %v1808_v12 = vld [vmem:[%s2879_s7] ss:$0 sm:$0xff]  ;;  %v807_v27 = vsub.s32 0, %v798_v26  ;;  %vm803_vm4 = vcmp.gt.s32.totalorder %v802_v30, %v798_v26 }
  0x98   : > { %v703_v19 = vld [vmem:[#allocation11 + $0x18] sm:$0xff]  ;;  %v702_v20 = vld [vmem:[#allocation11 + $0x10] sm:$0xff]  ;;  %v700_v22 = vld [vmem:[#allocation11] sm:$0xff]  ;;  %s507_s3 = scalar_lea.vmem %s2880_s8, %s506_s5  ;;  %s2403_s19 = smov 112  }
  0x99   : > { %v510_v23 = vld [vmem:[%s441_s27] sm:$0xff]  ;;  %s2404_s9 = smov 104   ;;  %s2405_s21 = smov 8  }
  0x9a   : > { %1898 = vmatpush3.xpose.msk.msra.mxu1 %vm520_vm1, %v608_v3  ;;  %1887 = vmatpush3.xpose.msk.msra.mxu0 %vm520_vm1, %v513_v4  ;;  %v794_v25 = vld [vmem:[%s507_s3] sm:$0x1]  ;;  %v1820_v44 = vld [vmem:[%s2879_s7 + $0x2] ss:$0 sm:$0xff]  ;;  %s2406_s24 = smov 16   ;;  %s2407_s29 = smov 24  }
  0x9b   : > { %1899 = vmatprep.subr.mxu1 %v2399_v0  ;;  %1888 = vmatprep.subr.mxu0 %v2399_v0  ;;  %vm795_vm3 = vcmp.gt.f32.partialorder %v794_v25, 0.5  ;;  %s1845_s23 = sshll.u32 %s2380_s12, 7  ;;  %s504_s27 = scalar_lea.vmem [#allocation14], %s2653_s28 }
  0x9c   : > { %v804_v29 = vsel %vm795_vm3, 1, %v2402_v28  ;;  %s1615_s15 = sshll.u32 %s504_s27, 4  ;;  %s2933_s20 = sld [smem:[#allocation30_spill]]  ;;  %s1616_s15 = int_to_ptr.vmem [resolvable:$true] %s1615_s15 }
  0x9d   : > { %v808_v31 = vrot.slane %v804_v29, %v807_v27  ;;  %s1601_s5 = scalar_lea.sflag [#allocation4], %s2650_s17  ;;  %s2296_s30 = scalar_lea.vmem %s1616_s15, 128 }
  0x9e   : > { %1900 = vmatpush3.xpose.msk.msra.mxu1 %vm520_vm1, %v607_v5  ;;  %1889 = vmatpush3.xpose.msk.msra.mxu0 %vm520_vm1, %v512_v6  ;;  %p2297_p12 = scmp.ne.s32.totalorder %s1616_s15, %s2296_s30  ;;  %p2934_p2 = scmp.ne.s32.totalorder %s2913_s26, 0 }
  0x9f   : > { %1901 = vmatprep.subr.mxu1 %v2399_v0  ;;  %1890 = vmatprep.subr.mxu0 %v2399_v0  ;;  %vm809_vm5 = vcmp.eq.s32.totalorder %v808_v31, 1  ;;  %s2408_s12 = smov [#allocation14]  }
  0xa0   : > { %vm2747_vm6 = vmor %vm809_vm5, %vm803_vm4  ;;  %p2298_p5 = pnand %p2297_p12, %p2934_p2  ;;  %s2300_s28 = sshll.u32 %s2408_s12, 4  ;;  %s2301_s28 = int_to_ptr.vmem [resolvable:$false] %s2300_s28 }
  0xa1   : > { %s2302_s22 = scalar_lea.vmem %s2301_s28, 256  ;;  %p2303_p1 = scmp.lt.s32.totalorder %s1616_s15, %s2301_s28 }
  0xa2   : > { %1902 = vmatpush3.xpose.msk.msra.mxu1 %vm520_vm1, %v606_v7  ;;  %1891 = vmatpush3.xpose.msk.msra.mxu0 %vm520_vm1, %v511_v8  ;;  %p2299_p10 = pneg %p2298_p5  ;;  %p2304_p7 = scmp.lt.s32.totalorder %s2302_s22, %s2296_s30 }
  0xa3   : > { %1917 = vmatprep.subr.mxu1 %v2399_v0  ;;  %1906 = vmatprep.subr.mxu0 %v2399_v0 }
  0xa4   : > { %p2305_p4 = por %p2304_p7, %p2303_p1 }
  0xa5   : > { %1904 = vmatmul.mubr.msk.f32.vlgmr.msra.gmra.mxu1 %vm520_vm1, %v509_v9  ;;  %1893 = vmatmul.mubr.msk.f32.vlgmr.msra.gmra.mxu0 %vm520_vm1, %v508_v10 }
  0xa6   : > { %1919 = vmatprep.mubr.msk.f32.mxu1 %vm2400_vm0, %v2399_v0  ;;  %1914 = vmatprep.mubr.msk.f32.mxu0 %vm2400_vm0, %v2399_v0  ;;  %p2306_p8 = pnand %p2305_p4, %p2299_p10 }
  0xa7   : > { %1907 = vmatpush3.xpose.msk.msra.mxu0 %vm520_vm1, %v703_v19 }
  0xa8   : > { %1908 = vmatprep.subr.mxu0 %v2399_v0 }
  0xab   : > { %1909 = vmatpush3.xpose.msk.msra.mxu0 %vm520_vm1, %v702_v20 }
  0xac   : > { %1910 = vmatprep.subr.mxu0 %v2399_v0 }
  0xaf   : > { %1911 = vmatpush3.xpose.msk.msra.mxu0 %vm520_vm1, %v701_v21 }
  0xb0   : > { %1912 = vmatprep.subr.mxu0 %v2399_v0 }
  0xb3   : > { %1913 = vmatpush3.xpose.msk.msra.mxu0 %vm520_vm1, %v700_v22 }
  0xb4   : > { %1957 = vmatprep.subr.mxu0 %v2399_v0 }
  0xb6   : > { %1915 = vmatmul.mubr.msk.f32.vlgmr.msra.gmra.mxu0 %vm520_vm1, %v510_v23 }
  0xb7   : > { %1965 = vmatprep.mubr.msk.f32.mxu0 %vm2400_vm0, %v2399_v0 }
 0x165   : > { %v696_v13 = vpop.f32.mrf.mxu1  ;;  %v602_v14 = vpop.f32.mrf.mxu0 }
 0x166   : > { %v2714_v15 = vadd.f32 %v1814_v11, %v696_v13  ;;  %v2716_v16 = vadd.f32 %v1808_v12, %v602_v14 }
 0x167   : > { %v1905_v17 = vpop.f32.mrf.mxu1  ;;  %v1894_v18 = vpop.f32.mrf.mxu0 }
 0x168   : > { %979 = vrot.lane.b32.xlu1 %v2714_v15, %s2401_s14  ;;  %1918 = vmatpush3.xpose.msk.msra.mxu1 %vm811_vm2, %v2714_v15 }
 0x169   : > { %1922 = vmatprep.subr.mxu1 %v2399_v0 }
 0x16b   : > { %1920 = vmatmul.mubr.msk.f32.vlgmr.msra.gmra.mxu1 %vm811_vm2, %v2716_v16 }
 0x16c   : > { %977 = vrot.lane.b32.xlu1 %v2716_v16, %s2401_s14  ;;  %1924 = vmatprep.mubr.msk.f32.mxu1 %vm2400_vm0, %v2399_v0 }
 0x176   : > { %v790_v43 = vpop.f32.mrf.mxu0 }
 0x177   : > { %v2758_v45 = vadd.f32 %v1820_v44, %v790_v43 }
 0x178   : > { %v1916_v46 = vpop.f32.mrf.mxu0 }
 0x179   : > { %1923 = vmatpush3.msra.mxu1 %v2758_v45 }
 0x17a   : > { %1927 = vmatprep.subr.mxu1 %v2399_v0 }
 0x1da   : > { %v980_v52 = vpop.permute.xlu1 %979 }
 0x1de   : > { %v978_v54 = vpop.permute.xlu1 %977 }
 0x22b   : > { %v884_v32 = vpop.f32.mrf.mxu1 }
 0x22c   : > { %v888_v34 = vmul.f32 0.17677669, %v884_v32 }
 0x22d   : > { %v1921_v35 = vpop.f32.mrf.mxu1 }
 0x22e   : > { %v889_v36 = vsel %vm2747_vm6, -100000.0, %v888_v34 }
 0x22f   : > { %v890_v37 = vsel %vm811_vm2, %v889_v36, -inf }
 0x230   : > { %891 = vmax.xlane.f32.xlu0 %v890_v37 }
 0x2b9   : > { %v892_v38 = vpop.xlane.xlu0 %891 }
 0x2ba   : > { %v893_v39 = vsub.f32 %v889_v36, %v892_v38 }
 0x2bc   : > { %v894_v40 = vmul.f32 1.442695, %v893_v39 }
 0x2be   : > { %2092 = vpow2.f32 %v894_v40 }
 0x2cb   : > { %v2093_v41 = vpop.eup %2092 }
 0x2cc   : > { %v896_v42 = vsel %vm811_vm2, %v2093_v41, 0.0 }
 0x2cd   : > { %897 = vadd.xlane.f32.xlu0 %v896_v42 }
 0x356   : > { %v898_v47 = vpop.xlane.xlu0 %897 }
 0x357   : > { %2094 = vrcp.f32 %v898_v47 }
 0x364   : > { %v2095_v48 = vpop.eup %2094 }
 0x365   : > { %v900_v49 = vmul.f32 %v2095_v48, %v898_v47 }
 0x367   : > { %v901_v50 = vsub.f32 2.0, %v900_v49 }
 0x369   : > { %v902_v51 = vmul.f32 %v2095_v48, %v901_v50 }
 0x36b   : > { %v903_v53 = vmul.f32 %v2093_v41, %v902_v51 }
 0x36d   : > { %1925 = vmatmul.mubr.msk.f32.vlgmr.msra.gmra.mxu1 %vm811_vm2, %v903_v53  ;;  %v1508_v53 = vld [vmem:[#allocation13 + $0x18] sm:$0xff] }
 0x36e   : > { %1928 = vmatpush3.xpose.msk.msra.mxu1 %vm811_vm2, %v980_v52  ;;  %1929 = vmatprep.mubr.msk.f32.mxu1 %vm2400_vm0, %v2399_v0 }
 0x36f   : > { %1932 = vmatprep.subr.mxu1 %v2399_v0  ;;  %1958 = vmatpush3.xpose.msk.msra.mxu0 %vm520_vm1, %v1508_v53 }
 0x370   : > { %1959 = vmatprep.subr.mxu0 %v2399_v0 }
 0x371   : > { %1930 = vmatmul.mubr.msk.f32.vlgmr.msra.gmra.mxu1 %vm811_vm2, %v978_v54  ;;  %v1507_v54 = vld [vmem:[#allocation13 + $0x10] sm:$0xff] }
 0x372   : > { %1934 = vmatprep.mubr.msk.f32.mxu1 %vm2400_vm0, %v2399_v0 }
 0x373   : > { %1960 = vmatpush3.xpose.msk.msra.mxu0 %vm520_vm1, %v1507_v54 }
 0x374   : > { %1961 = vmatprep.subr.mxu0 %v2399_v0 }
 0x42d   : > { %v2770_v55 = vpop.f32.mrf.mxu1 }
 0x42f   : > { %v1926_v56 = vpop.f32.mrf.mxu1 }
 0x430   : > { %v1506_v56 = vld [vmem:[#allocation13 + $0x8] sm:$0xff] }
 0x431   : > { %v1051_v57 = vpop.f32.mrf.mxu1  ;;  %1962 = vmatpush3.xpose.msk.msra.mxu0 %vm520_vm1, %v1506_v56 }
 0x432   : > { %v1055_v58 = vmul.f32 0.17677669, %v1051_v57  ;;  %1963 = vmatprep.subr.mxu0 %v2399_v0  ;;  %v1505_v57 = vld [vmem:[#allocation13] sm:$0xff] }
 0x433   : > { %v1931_v59 = vpop.f32.mrf.mxu1 }
 0x434   : > { %v1056_v60 = vsel %vm2747_vm6, -100000.0, %v1055_v58 }
 0x435   : > { %v1057_v61 = vsel %vm811_vm2, %v1056_v60, -inf  ;;  %1964 = vmatpush3.xpose.msk.msra.mxu0 %vm520_vm1, %v1505_v57 }
 0x436   : > { %1058 = vmax.xlane.f32.xlu0 %v1057_v61 }
 0x44c   : > { %1072 = vrot.lane.b32.xlu0 %v2758_v45, %s2401_s14  ;;  %s2829_s14 = scalar_lea.hbm %s2933_s20, %s1845_s23 }
 0x450   : > { %1150 = vrot.lane.b32.xlu0 %v2714_v15, %s2403_s19 }
 0x454   : > { %1148 = vrot.lane.b32.xlu0 %v2716_v16, %s2403_s19 }
 0x4bf   : > { %v1059_v62 = vpop.xlane.xlu0 %1058 }
 0x4c0   : > { %v1060_v63 = vsub.f32 %v1056_v60, %v1059_v62 }
 0x4c2   : > { %v1061_v1 = vmul.f32 1.442695, %v1060_v63 }
 0x4c3   : > { %v1073_v2 = vpop.permute.xlu0 %1072 }
 0x4c4   : > { %2096 = vpow2.f32 %v1061_v1  ;;  %1933 = vmatpush3.msra.mxu1 %v1073_v2  ;;  %v1838_v2 = vld [vmem:[%s2879_s7 + $0x3] ss:$0 sm:$0xff] }
 0x4c5   : > { %1937 = vmatprep.subr.mxu1 %v2399_v0 }
 0x4c7   : > { %v1151_v10 = vpop.permute.xlu0 %1150 }
 0x4cb   : > { %v1149_v12 = vpop.permute.xlu0 %1148 }
 0x4d1   : > { %v2097_v3 = vpop.eup %2096 }
 0x4d2   : > { %v1063_v4 = vsel %vm811_vm2, %v2097_v3, 0.0 }
 0x4d3   : > { %1064 = vadd.xlane.f32.xlu1 %v1063_v4 }
 0x4e4   : > { %1242 = vrot.lane.b32.xlu1 %v2758_v45, %s2403_s19 }
 0x55c   : > { %v1065_v5 = vpop.xlane.xlu1 %1064 }
 0x55d   : > { %2098 = vrcp.f32 %v1065_v5 }
 0x560   : > { %v1243_v13 = vpop.permute.xlu1 %1242 }
 0x56a   : > { %v2099_v6 = vpop.eup %2098 }
 0x56b   : > { %v1067_v7 = vmul.f32 %v2099_v6, %v1065_v5 }
 0x56d   : > { %v1068_v8 = vsub.f32 2.0, %v1067_v7 }
 0x56f   : > { %v1069_v9 = vmul.f32 %v2099_v6, %v1068_v8 }
 0x571   : > { %v1070_v11 = vmul.f32 %v2097_v3, %v1069_v9 }
 0x573   : > { %1935 = vmatmul.mubr.msk.f32.vlgmr.msra.gmra.mxu1 %vm811_vm2, %v1070_v11 }
 0x574   : > { %1938 = vmatpush3.xpose.msk.msra.mxu1 %vm811_vm2, %v1151_v10  ;;  %1939 = vmatprep.mubr.msk.f32.mxu1 %vm2400_vm0, %v2399_v0 }
 0x575   : > { %1942 = vmatprep.subr.mxu1 %v2399_v0 }
 0x577   : > { %1940 = vmatmul.mubr.msk.f32.vlgmr.msra.gmra.mxu1 %vm811_vm2, %v1149_v12 }
 0x578   : > { %1943 = vmatpush3.msra.mxu1 %v1243_v13  ;;  %1944 = vmatprep.mubr.msk.f32.mxu1 %vm2400_vm0, %v2399_v0 }
 0x579   : > { %1947 = vmatprep.subr.mxu1 %v2399_v0 }
 0x633   : > { %v1144_v14 = vpop.f32.mrf.mxu1 }
 0x635   : > { %v1936_v17 = vpop.f32.mrf.mxu1 }
 0x637   : > { %v1222_v18 = vpop.f32.mrf.mxu1 }
 0x638   : > { %v1226_v19 = vmul.f32 0.17677669, %v1222_v18 }
 0x639   : > { %v1941_v20 = vpop.f32.mrf.mxu1 }
 0x63a   : > { %v1227_v21 = vsel %vm2747_vm6, -100000.0, %v1226_v19 }
 0x63b   : > { %v1228_v22 = vsel %vm811_vm2, %v1227_v21, -inf }
 0x63c   : > { %1229 = vmax.xlane.f32.xlu0 %v1228_v22 }
 0x6c5   : > { %v1230_v23 = vpop.xlane.xlu0 %1229 }
 0x6c6   : > { %v1231_v24 = vsub.f32 %v1227_v21, %v1230_v23 }
 0x6c8   : > { %v1232_v25 = vmul.f32 1.442695, %v1231_v24 }
 0x6ca   : > { %2100 = vpow2.f32 %v1232_v25 }
 0x6d7   : > { %v2101_v26 = vpop.eup %2100 }
 0x6d8   : > { %v1234_v27 = vsel %vm811_vm2, %v2101_v26, 0.0 }
 0x6d9   : > { %1235 = vadd.xlane.f32.xlu1 %v1234_v27 }
 0x6ea   : > { %1320 = vrot.lane.b32.xlu1 %v2714_v15, %s2404_s9 }
 0x6ee   : > { %1318 = vrot.lane.b32.xlu1 %v2716_v16, %s2404_s9 }
 0x762   : > { %v1236_v28 = vpop.xlane.xlu1 %1235 }
 0x763   : > { %2102 = vrcp.f32 %v1236_v28 }
 0x766   : > { %v1321_v34 = vpop.permute.xlu1 %1320 }
 0x76a   : > { %v1319_v15 = vpop.permute.xlu1 %1318 }
 0x770   : > { %v2103_v29 = vpop.eup %2102 }
 0x771   : > { %v1238_v30 = vmul.f32 %v2103_v29, %v1236_v28 }
 0x773   : > { %v1239_v31 = vsub.f32 2.0, %v1238_v30 }
 0x775   : > { %v1240_v32 = vmul.f32 %v2103_v29, %v1239_v31 }
 0x777   : > { %v1241_v35 = vmul.f32 %v2101_v26, %v1240_v32 }
 0x779   : > { %1945 = vmatmul.mubr.msk.f32.vlgmr.msra.gmra.mxu1 %vm811_vm2, %v1241_v35 }
 0x77a   : > { %1948 = vmatpush3.xpose.msk.msra.mxu1 %vm811_vm2, %v1321_v34  ;;  %1949 = vmatprep.mubr.msk.f32.mxu1 %vm2400_vm0, %v2399_v0 }
 0x77b   : > { %1952 = vmatprep.subr.mxu1 %v2399_v0 }
 0x77d   : > { %1950 = vmatmul.mubr.msk.f32.vlgmr.msra.gmra.mxu1 %vm811_vm2, %v1319_v15 }
 0x77e   : > { %1954 = vmatprep.mubr.msk.f32.mxu1 %vm2400_vm0, %v2399_v0 }
 0x839   : > { %v1314_v16 = vpop.f32.mrf.mxu1 }
 0x83b   : > { %v1946_v36 = vpop.f32.mrf.mxu1 }
 0x83d   : > { %v1392_v37 = vpop.f32.mrf.mxu1 }
 0x83e   : > { %v1396_v38 = vmul.f32 0.17677669, %v1392_v37 }
 0x83f   : > { %v1951_v39 = vpop.f32.mrf.mxu1 }
 0x840   : > { %v1397_v40 = vsel %vm2747_vm6, -100000.0, %v1396_v38 }
 0x841   : > { %v1398_v41 = vsel %vm811_vm2, %v1397_v40, -inf }
 0x842   : > { %1399 = vmax.xlane.f32.xlu0 %v1398_v41 }
 0x858   : > { %1412 = vrot.lane.b32.xlu0 %v2758_v45, %s2404_s9 }
 0x85c   : > { %1489 = vrot.lane.b32.xlu0 %v1144_v14, %s2405_s21 }
 0x860   : > { %1493 = vrot.lane.b32.xlu0 %v1314_v16, %s2406_s24 }
 0x8cb   : > { %v1400_v42 = vpop.xlane.xlu0 %1399 }
 0x8cc   : > { %v1401_v43 = vsub.f32 %v1397_v40, %v1400_v42 }
 0x8ce   : > { %v1402_v44 = vmul.f32 1.442695, %v1401_v43 }
 0x8cf   : > { %v1413_v46 = vpop.permute.xlu0 %1412 }
 0x8d0   : > { %2104 = vpow2.f32 %v1402_v44  ;;  %1953 = vmatpush3.msra.mxu1 %v1413_v46 }
 0x8d3   : > { %v1490_v60 = vpop.permute.xlu0 %1489 }
 0x8d4   : > { %v1500_v62 = vsel %vm811_vm2, %v2770_v55, %v1490_v60 }
 0x8d7   : > { %v1494_v61 = vpop.permute.xlu0 %1493 }
 0x8d8   : > { %v1502_v63 = vsel %vm1501_vm7, %v1500_v62, %v1494_v61 }
 0x8dd   : > { %v2105_v47 = vpop.eup %2104 }
 0x8de   : > { %v1404_v48 = vsel %vm811_vm2, %v2105_v47, 0.0 }
 0x8df   : > { %1405 = vadd.xlane.f32.xlu1 %v1404_v48 }
 0x968   : > { %v1406_v33 = vpop.xlane.xlu1 %1405 }
 0x969   : > { %2106 = vrcp.f32 %v1406_v33 }
 0x976   : > { %v2107_v49 = vpop.eup %2106 }
 0x977   : > { %v1408_v50 = vmul.f32 %v2107_v49, %v1406_v33 }
 0x979   : > { %v1409_v51 = vsub.f32 2.0, %v1408_v50 }
 0x97b   : > { %v1410_v45 = vmul.f32 %v2107_v49, %v1409_v51 }
 0x97d   : > { %v1411_v52 = vmul.f32 %v2105_v47, %v1410_v45 }
 0x97f   : > { %1955 = vmatmul.mubr.msk.f32.vlgmr.msra.gmra.mxu1 %vm811_vm2, %v1411_v52 }
 0xa3f   : > { %v1484_v58 = vpop.f32.mrf.mxu1 }
 0xa40   : > { %1497 = vrot.lane.b32.xlu0 %v1484_v58, %s2407_s29 }
 0xa41   : > { %v1956_v59 = vpop.f32.mrf.mxu1 }
 0xab2   : > { %v1498_v1 = vpop.permute.xlu0 %1497 }
 0xab3   : > { %v1504_v0 = vsel %vm1503_vm8, %v1502_v63, %v1498_v1 }
 0xab4   : > { %1966 = vmatmul.mubr.msk.f32.vlgmr.msra.gmra.mxu0 %vm520_vm1, %v1504_v0 }
 0xb74   : > { %v1595_v3 = vpop.f32.mrf.mxu0 }
 0xb75   : > { %v1596_v4 = vadd.f32 %v1838_v2, %v1595_v3 }
 0xb76   : > { %v1967_v55 = vpop.f32.mrf.mxu0 }
 0xb77   : > { %1599 = vst.msk [vmem:[%s504_s27] sm:$0xff] %vm520_vm1, %v1596_v4 }
 0xb78   : > { %2309 = shalt.err (!%p2306_p8)
}
 0xb79   : > { %s2310_s3 = scalar_lea.hbm %s2829_s14, 128  ;;  %s2314_s13 = scalar_lea.hbm %s2933_s20, 256 }
 0xb7a   : > { %p2311_p6 = scmp.ne.s32.totalorder %s2829_s14, %s2310_s3  ;;  %p2315_p13 = scmp.lt.s32.totalorder %s2829_s14, %s2933_s20 }
 0xb7b   : > { %p2316_p9 = scmp.lt.s32.totalorder %s2314_s13, %s2310_s3 }
 0xb7c   : > { %p2312_p3 = pnand %p2311_p6, %p2934_p2 }
 0xb7d   : > { %p2317_p11 = por %p2316_p9, %p2315_p13 }
 0xb7e   : > { %p2313_p0 = pneg %p2312_p3 }
 0xb80   : > { %p2318_p12 = pnand %p2317_p11, %p2313_p0 }
 0xb82   : > { %2321 = shalt.err (!%p2318_p12)
}
 0xb83   : > { %1990 = dma.vmem_to_hbm [thread:$0]  (%p2934_p2), %s1616_s15, 128, %s2829_s14, %s1601_s5  }
 0xb84 PF: > { %s2935_s21 = sld [smem:[#allocation20_spill]] }
 0xb85   : > { %s2936_s24 = sld [smem:[#allocation25_spill]] }
 0xb86   : > { %s2937_s29 = sld [smem:[#allocation22_spill]] }
 0xb8a   : > { %s1627_s4 = sand.u32 1, %s2935_s21  }
 0xb8b   : > { %p2938_p5 = scmp.ne.s32.totalorder %s2936_s24, 0  ;;  %s1628_s16 = scalar_lea.sflag [#allocation4], %s1627_s4 }
 0xb8c   : > { %p2939_p10 = scmp.ge.s32.totalorder %s2937_s29, 2 }
 0xb8e   : > { %p2016_p1 = pnand %p2939_p10, %p2938_p5 }
 0xb90   : > { %p2017_p7 = pneg %p2016_p1 }
 0xb92   : > { %2363 = dma.done.wait (%p2017_p7), %s1628_s16, 128  }
 0xb93   : > { %2365 = vsyncadd (%p2017_p7), %s1628_s16, 4294967168  ;;  %s30_s14 = sadd.s32 1, %s2937_s29   ;;  %s2940_s26 = sld [smem:[#allocation24_spill]] }
 0xb94   : > { %p27_p4 = scmp.ge.s32.totalorder %s30_s14, 4   ;;  %s2941_s12 = sld [smem:[#allocation21_spill]] }
 0xb95   : > { %s2942_s13 = sld [smem:[#allocation23_spill]]  ;;  %s2943_s30 = smov %s2372_s10 }
 0xb96   : > { %s2944_s10 = smov %s2376_s11  ;;  %29 = sbr.rel (!%p27_p4) target bundleno = 16 (0x10), region = 144 }
 0xb99   : > { %s2945_s11 = smov %s2940_s26 }
 0xb9b   :  { %1633 = vsyncpa [#allocation3], 1 }
 0xb9c   :  { %1635 = vsyncpa [#allocation3 + $0x1], 1 }
 0xb9d   :  { %1636 = vsyncpa [#allocation6], 1 }
 0xb9e   :  { %1638 = vsyncpa [#allocation6 + $0x1], 1 }
 0xb9f   :  { %1639 = vsyncpa [#allocation9], 1 }
 0xba0   :  { %1640 = vsyncpa [#allocation12], 1 }
 0xba1   :  { %1641 = vsyncpa [#allocation4], 1 }
 0xba2   :  { %1643 = vsyncpa [#allocation4 + $0x1], 1 }

</bundles_post_ra>
